<compile_context>
chip_gen: v7x
topology: tpu7x:2x2x1
jax: 0.10.0
libtpu: 0.0.40
codegen_flags: <defaults>
</compile_context>

<pallas_src>
import functools

import jax
import jax.numpy as jnp
from jax.experimental import pallas as pl
from jax.experimental.pallas import tpu as pltpu


# ---------------------------------------------------------------------------
# Kernel: elementwise ReLU (the enforce_positive projection)
# ---------------------------------------------------------------------------
def _relu_kernel(w_ref, o_ref):
    # post_step_(): weight = relu(weight); dtype-matched zero avoids promotion.
    zero = jnp.zeros((), dtype=o_ref.dtype)
    o_ref[...] = jnp.maximum(w_ref[...], zero)


# ---------------------------------------------------------------------------
# Layout / tiling helpers
# ---------------------------------------------------------------------------
_LANE = 128
_MIN_PALLAS_BYTES = 512 * 1024   # below this, fused XLA maximum is strictly faster
_MIN_GRID_STEPS = 8              # guarantees pipelining + v7x dual-TC sharding
_COL_CANDIDATES = (4096, 2048, 1024, 512, 384, 256, 128)  # widest (lane-densest) first


def _sublane_for_itemsize(itemsize):
    """Native sublane packing granularity per dtype width."""
    if itemsize >= 4:
        return 8
    if itemsize == 2:
        return 16
    return 32


def _vmem_budget():
    """Per-generation (block_byte_cap, vmem_limit_bytes), conservative fallback."""
    try:
        vmem_cap = int(pltpu.get_tpu_info().vmem_capacity_bytes)
    except Exception:  # info unavailable -> assume the smallest VMEM (v7x-like)
        vmem_cap = 64 * 1024 * 1024
    if vmem_cap >= 128 * 1024 * 1024:      # v5e / v6e: 128 MiB physical
        return 8 * 1024 * 1024, 64 * 1024 * 1024
    # v7x-class: 64 MiB physical per TC -> stay well inside 32 MiB scoped budget
    return 4 * 1024 * 1024, 32 * 1024 * 1024


def _choose_layout(n, itemsize):
    """Pick (rows, cols, sublane): widest lane-dense view whose rows pack natively."""
    sublane = _sublane_for_itemsize(itemsize)
    for cols in _COL_CANDIDATES:
        if n % cols:
            continue
        rows = n // cols
        if rows % sublane == 0:
            return rows, cols, sublane
    return None


def _choose_tile_rows(rows, cols, itemsize, sublane, block_byte_cap):
    """Largest sublane-multiple row tile that divides rows, fits the VMEM cap,
    and leaves a grid of at least _MIN_GRID_STEPS steps for pipelining."""
    cap_rows_bytes = block_byte_cap // max(1, cols * itemsize)
    cap_rows_grid = max(sublane, rows // _MIN_GRID_STEPS)
    cap = max(sublane, min(cap_rows_bytes, cap_rows_grid))
    t = (cap // sublane) * sublane
    while t >= sublane:
        if rows % t == 0:
            return t
        t -= sublane
    return None  # no clean tiling; caller falls back to fused XLA


# ---------------------------------------------------------------------------
# Jitted, donated projection (true in-place HBM update via aliasing)
# ---------------------------------------------------------------------------
@functools.partial(jax.jit, static_argnums=(1, 2, 3), donate_argnums=(0,))
def _relu_pallas_jit(w, cols, tile_rows, vmem_limit_bytes):
    orig_shape = w.shape
    rows = w.size // cols
    w2d = w.reshape(rows, cols)
    out2d = pl.pallas_call(
        _relu_kernel,
        out_shape=jax.ShapeDtypeStruct((rows, cols), w.dtype),
        grid_spec=pltpu.PrefetchScalarGridSpec(
            num_scalar_prefetch=0,
            grid=(rows // tile_rows,),
            in_specs=[pl.BlockSpec((tile_rows, cols), lambda i: (i, 0))],
            out_specs=pl.BlockSpec((tile_rows, cols), lambda i: (i, 0)),
        ),
        # In-place parameter update: output reuses the (donated) weight buffer.
        input_output_aliases={0: 0},
        compiler_params=pltpu.CompilerParams(
            dimension_semantics=("parallel",),
            vmem_limit_bytes=vmem_limit_bytes,
        ),
    )(w2d)
    return out2d.reshape(orig_shape)


def relu_project(w):
    """ReLU projection of the weight, using the Pallas path when it pays off.

    NOTE: the Pallas path donates `w`; callers must not reuse the input array
    afterwards (the Multiplier wrapper rebinds self.weight, so this is safe).
    """
    n = int(w.size)
    nbytes = n * w.dtype.itemsize
    if nbytes < _MIN_PALLAS_BYTES:
        # Pure launch overhead for tiny parameters -> fused XLA elementwise op.
        return jnp.maximum(w, jnp.zeros((), dtype=w.dtype))

    layout = _choose_layout(n, w.dtype.itemsize)
    if layout is None:
        # Cannot view lane-dense without padding; masked stores would dominate.
        return jnp.maximum(w, jnp.zeros((), dtype=w.dtype))
    rows, cols, sublane = layout

    block_byte_cap, vmem_limit = _vmem_budget()
    tile_rows = _choose_tile_rows(rows, cols, w.dtype.itemsize, sublane, block_byte_cap)
    if tile_rows is None:
        return jnp.maximum(w, jnp.zeros((), dtype=w.dtype))

    return _relu_pallas_jit(w, cols, tile_rows, vmem_limit)


# ---------------------------------------------------------------------------
# Wrapper mirroring the PyTorch module
# ---------------------------------------------------------------------------
class Multiplier:
    def __init__(self, init, enforce_positive: bool = False):
        self.enforce_positive = enforce_positive
        self.weight = init  # parameter

    @property
    def shape(self):
        return self.weight.shape

    def forward(self):
        # forward() is a pure identity over the parameter: returning the array
        # is free and exactly matches the torch semantics (no HBM round-trip).
        return self.weight

    def post_step_(self):
        if self.enforce_positive:
            # relu_project donates the old weight buffer; rebind immediately.
            self.weight = relu_project(self.weight)

    # TODO(synk): state_dict/load_state_dict/device bookkeeping are framework
    # plumbing with no compute; omitted from the kernel port.


# ---------------------------------------------------------------------------
# Demo / self-test
# ---------------------------------------------------------------------------
if __name__ == "__main__":
    key = jax.random.PRNGKey(0)

    # Main case: 2048 x 256 f32 = 2 MiB -> lane-dense view (128, 4096),
    # tile_rows=16, grid=(8,): multi-step pipelined Pallas ReLU path.
    init = jax.random.normal(key, (2048, 256), dtype=jnp.float32)
    mult = Multiplier(init, enforce_positive=True)

    # forward(): must return the weight exactly (check BEFORE donation).
    out = jax.block_until_ready(mult.forward())
    assert out.shape == init.shape and out.dtype == init.dtype
    assert bool(jnp.allclose(out, init)), "forward() must return weight unchanged"

    # Reference result computed before post_step_ (the weight buffer is donated).
    expected = jax.block_until_ready(jnp.maximum(init, 0.0))

    # post_step_(): in-place ReLU projection (jit + donated Pallas kernel path).
    mult.post_step_()
    w_after = jax.block_until_ready(mult.weight)
    assert w_after.shape == expected.shape and w_after.dtype == expected.dtype
    assert bool(jnp.allclose(w_after, expected)), "post_step_ ReLU mismatch"

    # forward() again reflects the updated weight.
    out2 = jax.block_until_ready(mult.forward())
    assert bool(jnp.allclose(out2, expected))

    # Tiny-weight case: exercises the fused-XLA fallback (no kernel overhead).
    key2 = jax.random.PRNGKey(1)
    small_init = jax.random.normal(key2, (16, 32), dtype=jnp.float32)
    small_expected = jnp.maximum(small_init, 0.0)
    small = Multiplier(small_init, enforce_positive=True)
    small.post_step_()
    w_small = jax.block_until_ready(small.weight)
    assert bool(jnp.allclose(w_small, small_expected))

    # enforce_positive=False case: post_step_ must be a no-op.
    noop = Multiplier(small_init, enforce_positive=False)
    noop.post_step_()
    assert noop.weight is small_init

    print("KERNEL_OK")
</pallas_src>

<mosaic_0001>
module attributes {stable_mosaic.version = 11 : i64} {
  func.func @_relu_kernel(%arg0: i32, %arg1: memref<16x4096xf32, #tpu.memory_space<vmem>>, %arg2: memref<16x4096xf32, #tpu.memory_space<vmem>>) attributes {dimension_semantics = [#tpu.dimension_semantics<parallel>], iteration_bounds = array<i64: 8>, scalar_prefetch = 0 : i64, scratch_operands = 0 : i64, tpu.core_type = #tpu.core_type<tc>, window_params = [{transform_indices = @transform_0, window_bounds = array<i64: 16, 4096>}, {transform_indices = @transform_1, window_bounds = array<i64: 16, 4096>}]} {
    %c0 = arith.constant 0 : index
    %c0_0 = arith.constant 0 : index
    %0 = vector.load %arg1[%c0, %c0_0] : memref<16x4096xf32, #tpu.memory_space<vmem>>, vector<16x4096xf32>
    %cst = arith.constant 0.000000e+00 : f32
    %1 = vector.broadcast %cst : f32 to vector<16x4096xf32>
    %2 = arith.maximumf %0, %1 : vector<16x4096xf32>
    %c0_1 = arith.constant 0 : index
    %c0_2 = arith.constant 0 : index
    %3 = vector.load %arg2[%c0_1, %c0_2] : memref<16x4096xf32, #tpu.memory_space<vmem>>, vector<16x4096xf32>
    tpu.vector_store %arg2[%c0_1, %c0_2], %2 {strides = array<i32>} : memref<16x4096xf32, #tpu.memory_space<vmem>>, vector<16x4096xf32>,
    return
  }
  func.func @transform_0(%arg0: i32) -> (i32, i32) {
    %c0_i32 = arith.constant 0 : i32
    %c0_i32_0 = arith.constant 0 : i32
    return %arg0, %c0_i32 : i32, i32
  }
  func.func @transform_1(%arg0: i32) -> (i32, i32) {
    %c0_i32 = arith.constant 0 : i32
    %c0_i32_0 = arith.constant 0 : i32
    return %arg0, %c0_i32 : i32, i32
  }
}

</mosaic_0001>

<bundles_post_ra>
// kernel: _relu_pallas_jit.1
= control target key start
LH: loop header
LB: loop body
LE: loop exit
PB: predicated region body
PF: predicated region fallthrough
CT: control target
= control target key end

     0   :  { %s416_s6 = smov 0   ;;  %s890_s0 = inlined_call_operand.vmem [shape: f32[128,4096], index: 0, kind: input, shape index: {}, may-alias: {0,1}]   ;;  %s891_s1 = inlined_call_operand.vmem [shape: f32[128,4096], index: 1, kind: output, shape index: {}, may-alias: {0,1}]  }
   0x1 LB: > { %s375_s7 = sadd.s32 4294967295, %s404_s6   ;;  %p379_p0 = scmp.ge.s32.totalorder %s404_s6, 1  ;;  %s404_s6 = sphi %s416_s6, %s11_s6  }
   0x2   : > { %p89_p1 = scmp.lt.s32.totalorder %s404_s6, 9 }
   0x4   : > { %p90_p2 = pnand %p379_p0, %p89_p1 }
   0x6   : > { %93 = sbr.rel (%p90_p2) target bundleno = 74 (0x4a), region = 24 }
   0xd   : > { %s380_s8 = sshll.u32 %s375_s7, 1 }
   0xe   : > { %p112_p3 = scmp.lt.s32.totalorder %s380_s8, 15 }
  0x10   : > { %s973_s8 = smov (!%p112_p3, %s380_s8), 15 }
  0x11   : > { %s388_s9 = sshll.u32 %s973_s8, 8 }
  0x12   : > { %s432_s12 = scalar_lea.vmem %s890_s0, %s388_s9  ;;  %s664_s15 = scalar_lea.vmem %s891_s1, %s388_s9 }
  0x13   : > { %v435_v0 = vld [vmem:[%s432_s12] sm:$0xff]  ;;  %v438_v1 = vld [vmem:[%s432_s12 + $0x8] sm:$0xff]  ;;  %v441_v2 = vld [vmem:[%s432_s12 + $0x10] sm:$0xff] }
  0x14   : > { %v444_v3 = vld [vmem:[%s432_s12 + $0x18] sm:$0xff]  ;;  %v447_v4 = vld [vmem:[%s432_s12 + $0x20] sm:$0xff]  ;;  %v450_v5 = vld [vmem:[%s432_s12 + $0x28] sm:$0xff]  ;;  %v905_v12 = vmax.f32 %v438_v1, 0.0  ;;  %v906_v18 = vmax.f32 %v441_v2, 0.0 }
  0x15   : > { %v456_v9 = vld [vmem:[%s432_s12 + $0x30] sm:$0xff]  ;;  %v459_v10 = vld [vmem:[%s432_s12 + $0x38] sm:$0xff]  ;;  %v462_v11 = vld [vmem:[%s432_s12 + $0x40] sm:$0xff] }
  0x16   : > { %v468_v15 = vld [vmem:[%s432_s12 + $0x48] sm:$0xff]  ;;  %v471_v16 = vld [vmem:[%s432_s12 + $0x50] sm:$0xff]  ;;  %v474_v17 = vld [vmem:[%s432_s12 + $0x58] sm:$0xff]  ;;  %v910_v1 = vmax.f32 %v456_v9, 0.0  ;;  %v911_v2 = vmax.f32 %v459_v10, 0.0 }
  0x17   : > { %v480_v21 = vld [vmem:[%s432_s12 + $0x60] sm:$0xff]  ;;  %v483_v22 = vld [vmem:[%s432_s12 + $0x68] sm:$0xff]  ;;  %v486_v23 = vld [vmem:[%s432_s12 + $0x70] sm:$0xff]  ;;  %v915_v9 = vmax.f32 %v474_v17, 0.0 }
  0x18   : > { %v492_v27 = vld [vmem:[%s432_s12 + $0x78] sm:$0xff]  ;;  %v495_v28 = vld [vmem:[%s432_s12 + $0x80] sm:$0xff]  ;;  %v498_v29 = vld [vmem:[%s432_s12 + $0x88] sm:$0xff]  ;;  %v916_v10 = vmax.f32 %v480_v21, 0.0 }
  0x19   : > { %v504_v33 = vld [vmem:[%s432_s12 + $0x90] sm:$0xff]  ;;  %v507_v34 = vld [vmem:[%s432_s12 + $0x98] sm:$0xff]  ;;  %v510_v35 = vld [vmem:[%s432_s12 + $0xa0] sm:$0xff] }
  0x1a   : > { %v516_v39 = vld [vmem:[%s432_s12 + $0xa8] sm:$0xff]  ;;  %v519_v40 = vld [vmem:[%s432_s12 + $0xb0] sm:$0xff]  ;;  %v522_v41 = vld [vmem:[%s432_s12 + $0xb8] sm:$0xff]  ;;  %v922_v17 = vmax.f32 %v504_v33, 0.0  ;;  %v924_v21 = vmax.f32 %v510_v35, 0.0 }
  0x1b   : > { %v528_v45 = vld [vmem:[%s432_s12 + $0xc0] sm:$0xff]  ;;  %v531_v46 = vld [vmem:[%s432_s12 + $0xc8] sm:$0xff]  ;;  %v534_v47 = vld [vmem:[%s432_s12 + $0xd0] sm:$0xff] }
  0x1c   : > { %v540_v51 = vld [vmem:[%s432_s12 + $0xd8] sm:$0xff]  ;;  %v543_v52 = vld [vmem:[%s432_s12 + $0xe0] sm:$0xff]  ;;  %v546_v53 = vld [vmem:[%s432_s12 + $0xe8] sm:$0xff] }
  0x1d   : > { %v552_v57 = vld [vmem:[%s432_s12 + $0xf0] sm:$0xff]  ;;  %v555_v58 = vld [vmem:[%s432_s12 + $0xf8] sm:$0xff]  ;;  %v558_v59 = vld [vmem:[%s432_s12 + $0x100] sm:$0xff]  ;;  %v932_v33 = vmax.f32 %v543_v52, 0.0 }
  0x1e   : > { %v564_v63 = vld [vmem:[%s432_s12 + $0x108] sm:$0xff]  ;;  %v567_v55 = vld [vmem:[%s432_s12 + $0x110] sm:$0xff]  ;;  %v570_v56 = vld [vmem:[%s432_s12 + $0x118] sm:$0xff]  ;;  %v934_v35 = vmax.f32 %v552_v57, 0.0 }
  0x1f   : > { %v576_v49 = vld [vmem:[%s432_s12 + $0x120] sm:$0xff]  ;;  %v579_v61 = vld [vmem:[%s432_s12 + $0x128] sm:$0xff]  ;;  %v582_v62 = vld [vmem:[%s432_s12 + $0x130] sm:$0xff] }
  0x20   : > { %v588_v43 = vld [vmem:[%s432_s12 + $0x138] sm:$0xff]  ;;  %v591_v50 = vld [vmem:[%s432_s12 + $0x140] sm:$0xff]  ;;  %v594_v60 = vld [vmem:[%s432_s12 + $0x148] sm:$0xff]  ;;  %v942_v52 = vmax.f32 %v582_v62, 0.0 }
  0x21   : > { %v600_v37 = vld [vmem:[%s432_s12 + $0x150] sm:$0xff]  ;;  %v603_v44 = vld [vmem:[%s432_s12 + $0x158] sm:$0xff]  ;;  %v606_v54 = vld [vmem:[%s432_s12 + $0x160] sm:$0xff] }
  0x22   : > { %v612_v31 = vld [vmem:[%s432_s12 + $0x168] sm:$0xff]  ;;  %v615_v38 = vld [vmem:[%s432_s12 + $0x170] sm:$0xff]  ;;  %v618_v48 = vld [vmem:[%s432_s12 + $0x178] sm:$0xff]  ;;  %v947_v57 = vmax.f32 %v603_v44, 0.0 }
  0x23   : > { %v624_v25 = vld [vmem:[%s432_s12 + $0x180] sm:$0xff]  ;;  %v627_v32 = vld [vmem:[%s432_s12 + $0x188] sm:$0xff]  ;;  %v630_v42 = vld [vmem:[%s432_s12 + $0x190] sm:$0xff] }
  0x24   : > { %v636_v26 = vld [vmem:[%s432_s12 + $0x198] sm:$0xff]  ;;  %v639_v19 = vld [vmem:[%s432_s12 + $0x1a0] sm:$0xff]  ;;  %v642_v36 = vld [vmem:[%s432_s12 + $0x1a8] sm:$0xff]  ;;  %v953_v44 = vmax.f32 %v627_v32, 0.0 }
  0x25   : > { %898 = vst [vmem:[#allocation2_spill] sm:$0xff] %v636_v26  ;;  %899 = vst [vmem:[#allocation3_spill] sm:$0xff] %v639_v19  ;;  %v648_v20 = vld [vmem:[%s432_s12 + $0x1b0] sm:$0xff]  ;;  %v651_v13 = vld [vmem:[%s432_s12 + $0x1b8] sm:$0xff]  ;;  %v904_v26 = vmax.f32 %v435_v0, 0.0  ;;  %v909_v0 = vmax.f32 %v450_v5, 0.0 }
  0x26   : > { %900 = vst [vmem:[#allocation4_spill] sm:$0xff] %v642_v36  ;;  %901 = vst [vmem:[#allocation5_spill] sm:$0xff] %v648_v20  ;;  %v654_v30 = vld [vmem:[%s432_s12 + $0x1c0] sm:$0xff]  ;;  %v667_v24 = vld [vmem:[%s432_s12 + $0x1c8] sm:$0xff]  ;;  %v914_v5 = vmax.f32 %v471_v16, 0.0  ;;  %v921_v16 = vmax.f32 %v498_v29, 0.0 }
  0x27   : > { %902 = vst [vmem:[#allocation6_spill] sm:$0xff] %v651_v13  ;;  %903 = vst [vmem:[#allocation7_spill] sm:$0xff] %v654_v30  ;;  %v670_v14 = vld [vmem:[%s432_s12 + $0x1d0] sm:$0xff]  ;;  %v673_v7 = vld [vmem:[%s432_s12 + $0x1d8] sm:$0xff]  ;;  %v907_v30 = vmax.f32 %v444_v3, 0.0  ;;  %v908_v13 = vmax.f32 %v447_v4, 0.0 }
  0x28   : > { %v679_v6 = vld [vmem:[%s432_s12 + $0x1e0] sm:$0xff]  ;;  %v682_v36 = vld [vmem:[%s432_s12 + $0x1e8] sm:$0xff]  ;;  %v685_v19 = vld [vmem:[%s432_s12 + $0x1f0] sm:$0xff]  ;;  %v912_v3 = vmax.f32 %v462_v11, 0.0  ;;  %v913_v4 = vmax.f32 %v468_v15, 0.0  ;;  %v917_v11 = vmax.f32 %v483_v22, 0.0 }
  0x29   : > { %v691_v8 = vld [vmem:[%s432_s12 + $0x1f8] sm:$0xff]  ;;  %v251_v20 = vmax.f32 %v685_v19, 0.0  ;;  %v920_v15 = vmax.f32 %v495_v28, 0.0  ;;  %v925_v22 = vmax.f32 %v516_v39, 0.0  ;;  %v929_v28 = vmax.f32 %v531_v46, 0.0 }
  0x2a   : > { %253 = vst [vmem:[%s664_s15] sm:$0xff] %v904_v26  ;;  %254 = vst [vmem:[%s664_s15 + $0x8] sm:$0xff] %v905_v12  ;;  %v918_v12 = vmax.f32 %v486_v23, 0.0  ;;  %v926_v23 = vmax.f32 %v519_v40, 0.0  ;;  %v927_v26 = vmax.f32 %v522_v41, 0.0  ;;  %v930_v29 = vmax.f32 %v534_v47, 0.0 }
  0x2b   : > { %255 = vst [vmem:[%s664_s15 + $0x10] sm:$0xff] %v906_v18  ;;  %256 = vst [vmem:[%s664_s15 + $0x18] sm:$0xff] %v907_v30  ;;  %v923_v18 = vmax.f32 %v507_v34, 0.0  ;;  %v931_v30 = vmax.f32 %v540_v51, 0.0  ;;  %v933_v34 = vmax.f32 %v546_v53, 0.0  ;;  %v935_v39 = vmax.f32 %v555_v58, 0.0 }
  0x2c   : > { %257 = vst [vmem:[%s664_s15 + $0x20] sm:$0xff] %v908_v13  ;;  %258 = vst [vmem:[%s664_s15 + $0x28] sm:$0xff] %v909_v0  ;;  %v919_v13 = vmax.f32 %v492_v27, 0.0  ;;  %v928_v27 = vmax.f32 %v528_v45, 0.0  ;;  %v936_v40 = vmax.f32 %v558_v59, 0.0  ;;  %v937_v41 = vmax.f32 %v564_v63, 0.0 }
  0x2d   : > { %259 = vst [vmem:[%s664_s15 + $0x30] sm:$0xff] %v910_v1  ;;  %260 = vst [vmem:[%s664_s15 + $0x38] sm:$0xff] %v911_v2  ;;  %v938_v45 = vmax.f32 %v567_v55, 0.0  ;;  %v939_v46 = vmax.f32 %v570_v56, 0.0  ;;  %v940_v47 = vmax.f32 %v576_v49, 0.0  ;;  %v941_v51 = vmax.f32 %v579_v61, 0.0 }
  0x2e   : > { %261 = vst [vmem:[%s664_s15 + $0x40] sm:$0xff] %v912_v3  ;;  %262 = vst [vmem:[%s664_s15 + $0x48] sm:$0xff] %v913_v4  ;;  %v943_v53 = vmax.f32 %v588_v43, 0.0  ;;  %v944_v55 = vmax.f32 %v591_v50, 0.0  ;;  %v945_v49 = vmax.f32 %v594_v60, 0.0  ;;  %v946_v56 = vmax.f32 %v600_v37, 0.0 }
  0x2f   : > { %263 = vst [vmem:[%s664_s15 + $0x50] sm:$0xff] %v914_v5  ;;  %264 = vst [vmem:[%s664_s15 + $0x58] sm:$0xff] %v915_v9  ;;  %v948_v43 = vmax.f32 %v606_v54, 0.0  ;;  %v949_v50 = vmax.f32 %v612_v31, 0.0  ;;  %v950_v58 = vmax.f32 %v615_v38, 0.0  ;;  %v951_v59 = vmax.f32 %v618_v48, 0.0 }
  0x30   : > { %265 = vst [vmem:[%s664_s15 + $0x60] sm:$0xff] %v916_v10  ;;  %266 = vst [vmem:[%s664_s15 + $0x68] sm:$0xff] %v917_v11  ;;  %v952_v37 = vmax.f32 %v624_v25, 0.0  ;;  %v954_v54 = vmax.f32 %v630_v42, 0.0  ;;  %v955_v31 = vld [vmem:[#allocation2_spill] sm:$0xff]  ;;  %v957_v38 = vld [vmem:[#allocation3_spill] sm:$0xff] }
  0x31   : > { %267 = vst [vmem:[%s664_s15 + $0x70] sm:$0xff] %v918_v12  ;;  %268 = vst [vmem:[%s664_s15 + $0x78] sm:$0xff] %v919_v13  ;;  %v956_v60 = vmax.f32 %v955_v31, 0.0  ;;  %v958_v61 = vmax.f32 %v957_v38, 0.0  ;;  %v959_v48 = vld [vmem:[#allocation4_spill] sm:$0xff]  ;;  %v961_v63 = vld [vmem:[#allocation5_spill] sm:$0xff] }
  0x32   : > { %269 = vst [vmem:[%s664_s15 + $0x80] sm:$0xff] %v920_v15  ;;  %270 = vst [vmem:[%s664_s15 + $0x88] sm:$0xff] %v921_v16  ;;  %v960_v62 = vmax.f32 %v959_v48, 0.0  ;;  %v962_v25 = vmax.f32 %v961_v63, 0.0  ;;  %v963_v0 = vld [vmem:[#allocation6_spill] sm:$0xff]  ;;  %v965_v32 = vld [vmem:[#allocation7_spill] sm:$0xff] }
  0x33   : > { %271 = vst [vmem:[%s664_s15 + $0x90] sm:$0xff] %v922_v17  ;;  %272 = vst [vmem:[%s664_s15 + $0x98] sm:$0xff] %v923_v18  ;;  %v964_v1 = vmax.f32 %v963_v0, 0.0  ;;  %v966_v2 = vmax.f32 %v965_v32, 0.0  ;;  %v967_v42 = vmax.f32 %v667_v24, 0.0  ;;  %v968_v3 = vmax.f32 %v670_v14, 0.0 }
  0x34   : > { %273 = vst [vmem:[%s664_s15 + $0xa0] sm:$0xff] %v924_v21  ;;  %274 = vst [vmem:[%s664_s15 + $0xa8] sm:$0xff] %v925_v22  ;;  %v969_v4 = vmax.f32 %v673_v7, 0.0  ;;  %v252_v5 = vmax.f32 %v691_v8, 0.0  ;;  %v970_v9 = vmax.f32 %v679_v6, 0.0  ;;  %v971_v10 = vmax.f32 %v682_v36, 0.0 }
  0x35   : > { %275 = vst [vmem:[%s664_s15 + $0xb0] sm:$0xff] %v926_v23  ;;  %276 = vst [vmem:[%s664_s15 + $0xb8] sm:$0xff] %v927_v26 }
  0x36   : > { %277 = vst [vmem:[%s664_s15 + $0xc0] sm:$0xff] %v928_v27  ;;  %278 = vst [vmem:[%s664_s15 + $0xc8] sm:$0xff] %v929_v28 }
  0x37   : > { %279 = vst [vmem:[%s664_s15 + $0xd0] sm:$0xff] %v930_v29  ;;  %280 = vst [vmem:[%s664_s15 + $0xd8] sm:$0xff] %v931_v30 }
  0x38   : > { %281 = vst [vmem:[%s664_s15 + $0xe0] sm:$0xff] %v932_v33  ;;  %282 = vst [vmem:[%s664_s15 + $0xe8] sm:$0xff] %v933_v34 }
  0x39   : > { %283 = vst [vmem:[%s664_s15 + $0xf0] sm:$0xff] %v934_v35  ;;  %284 = vst [vmem:[%s664_s15 + $0xf8] sm:$0xff] %v935_v39 }
  0x3a   : > { %285 = vst [vmem:[%s664_s15 + $0x100] sm:$0xff] %v936_v40  ;;  %286 = vst [vmem:[%s664_s15 + $0x108] sm:$0xff] %v937_v41 }
  0x3b   : > { %287 = vst [vmem:[%s664_s15 + $0x110] sm:$0xff] %v938_v45  ;;  %288 = vst [vmem:[%s664_s15 + $0x118] sm:$0xff] %v939_v46 }
  0x3c   : > { %289 = vst [vmem:[%s664_s15 + $0x120] sm:$0xff] %v940_v47  ;;  %290 = vst [vmem:[%s664_s15 + $0x128] sm:$0xff] %v941_v51 }
  0x3d   : > { %291 = vst [vmem:[%s664_s15 + $0x130] sm:$0xff] %v942_v52  ;;  %292 = vst [vmem:[%s664_s15 + $0x138] sm:$0xff] %v943_v53 }
  0x3e   : > { %293 = vst [vmem:[%s664_s15 + $0x140] sm:$0xff] %v944_v55  ;;  %294 = vst [vmem:[%s664_s15 + $0x148] sm:$0xff] %v945_v49 }
  0x3f   : > { %295 = vst [vmem:[%s664_s15 + $0x150] sm:$0xff] %v946_v56  ;;  %296 = vst [vmem:[%s664_s15 + $0x158] sm:$0xff] %v947_v57 }
  0x40   : > { %297 = vst [vmem:[%s664_s15 + $0x160] sm:$0xff] %v948_v43  ;;  %298 = vst [vmem:[%s664_s15 + $0x168] sm:$0xff] %v949_v50 }
  0x41   : > { %299 = vst [vmem:[%s664_s15 + $0x170] sm:$0xff] %v950_v58  ;;  %300 = vst [vmem:[%s664_s15 + $0x178] sm:$0xff] %v951_v59 }
  0x42   : > { %301 = vst [vmem:[%s664_s15 + $0x180] sm:$0xff] %v952_v37  ;;  %302 = vst [vmem:[%s664_s15 + $0x188] sm:$0xff] %v953_v44 }
  0x43   : > { %303 = vst [vmem:[%s664_s15 + $0x190] sm:$0xff] %v954_v54  ;;  %304 = vst [vmem:[%s664_s15 + $0x198] sm:$0xff] %v956_v60 }
  0x44   : > { %305 = vst [vmem:[%s664_s15 + $0x1a0] sm:$0xff] %v958_v61  ;;  %306 = vst [vmem:[%s664_s15 + $0x1a8] sm:$0xff] %v960_v62 }
  0x45   : > { %307 = vst [vmem:[%s664_s15 + $0x1b0] sm:$0xff] %v962_v25  ;;  %308 = vst [vmem:[%s664_s15 + $0x1b8] sm:$0xff] %v964_v1 }
  0x46   : > { %309 = vst [vmem:[%s664_s15 + $0x1c0] sm:$0xff] %v966_v2  ;;  %310 = vst [vmem:[%s664_s15 + $0x1c8] sm:$0xff] %v967_v42 }
  0x47   : > { %311 = vst [vmem:[%s664_s15 + $0x1d0] sm:$0xff] %v968_v3  ;;  %312 = vst [vmem:[%s664_s15 + $0x1d8] sm:$0xff] %v969_v4 }
  0x48   : > { %313 = vst [vmem:[%s664_s15 + $0x1e0] sm:$0xff] %v970_v9  ;;  %314 = vst [vmem:[%s664_s15 + $0x1e8] sm:$0xff] %v971_v10 }
  0x49   : > { %315 = vst [vmem:[%s664_s15 + $0x1f0] sm:$0xff] %v251_v20  ;;  %316 = vst [vmem:[%s664_s15 + $0x1f8] sm:$0xff] %v252_v5 }
  0x4a PF: > { %s11_s6 = sadd.s32 1, %s404_s6  }
  0x4b   : > { %p8_p4 = scmp.ge.s32.totalorder %s11_s6, 10  }
  0x4d   :  { %10 = sbr.rel (!%p8_p4) target bundleno = 1 (0x1), region = 54 }

</bundles_post_ra>
